<compile_context>
chip_gen: v6e
topology: v6e:2x2x1
jax: 0.10.0
libtpu: 0.0.40
codegen_flags: <defaults>
</compile_context>

<pallas_src>
import functools
from typing import Dict, List, Tuple

import numpy as np
import jax
import jax.numpy as jnp
from jax.experimental import pallas as pl
from jax.experimental.pallas import tpu as pltpu

_QAOA_DEPTH = 2
_NUM_QUBITS = 4

_LANES = 128            # Gray-code configurations live on the lane axis
_DEFAULT_TILE_B = 256   # parameter sets per grid step (batch on the sublane axis)


def _round_up(x: int, m: int) -> int:
    return -(-x // m) * m


def _int_pow(x, n: int):
    """x**n for a static positive integer n via square-and-multiply (log depth)."""
    assert n >= 1
    result = None
    base = x
    while n > 0:
        if n & 1:
            result = base if result is None else result * base
        n >>= 1
        if n:
            base = base * base
    return result


def _qaoa_kernel(angles_ref, bits_ref, coef_ref, out_ref, *,
                 num_qubits, active_cols, passive_cols):
    """One grid step = TILE_B parameter sets (sublanes) x all Gray-code configs (lanes).

       fac_{b,i,k} = bit_{i,k} ? sin(theta_{b,k}) : cos(theta_{b,k})
       r_{b,i}     = prod_k fac_{b,i,k}           (unrolled k-loop, full-width VPU ops)
       out_{b,:}   = (r_{b,:} ** NUM_QUBITS) @ coef   (single MXU pass; Re@lane0, Im@lane1)

    Padding correctness: only columns k < num_states are ever read (static loop bounds),
    padded configuration lanes have zero bits AND zero coefficients, padded batch rows
    are discarded by the wrapper.  No in-kernel masking needed.
    """
    ang = angles_ref[...]                        # (TB, 128) f32, zero padded
    sin_t = jnp.sin(ang)                         # evaluated once per (batch, k)
    cos_t = jnp.cos(ang)

    # Factors whose bit column is all-zero multiply EVERY configuration by cos(theta_k):
    # accumulate them on a narrow (TB,1) column (no lane broadcasts inside this loop).
    pas = None
    for k in passive_cols:
        col = cos_t[:, k:k + 1]                  # (TB, 1)
        pas = col if pas is None else pas * col

    # Active factors: full-width (TB,128) broadcast ops, zero cross-lane data movement.
    r = None
    for k in active_cols:
        cos_col = cos_t[:, k:k + 1]              # (TB, 1)
        sin_col = sin_t[:, k:k + 1]              # (TB, 1)
        bits_row = bits_ref[k:k + 1, :]          # (1, 128): bit k of configuration i
        fac = cos_col + bits_row * (sin_col - cos_col)   # cos + bits*(sin-cos)
        r = fac if r is None else r * fac

    if r is None:                                # degenerate Hamiltonians only
        r = jnp.ones(out_ref.shape, jnp.float32)
    if pas is not None:
        r = r * pas                              # single lane-broadcast multiply

    # The common per-factor scalar multiplies every qubit's 2x2 ring matrix, hence it
    # appears to the power num_qubits in each trace term.  Square-and-multiply.
    r_n = _int_pow(r, num_qubits)                # (TB, 128)

    # Fold the static complex coefficients and reduce over configurations on the MXU.
    # coef[i,0]=Re, coef[i,1]=Im, all other columns zero -> lane-dense output tile.
    out_ref[...] = jnp.dot(r_n, coef_ref[...], preferred_element_type=jnp.float32)


def _ham_key(hamiltonian: List[Tuple[float, Tuple[bool, ...]]]):
    return tuple((float(w), tuple(bool(b) for b in f)) for w, f in hamiltonian)


@functools.lru_cache(maxsize=None)
def _build_static_tables(ham_key) -> Dict:
    """Unroll the static Hamiltonian structure into kernel tables (exact host arithmetic)."""
    depth, nq = _QAOA_DEPTH, _NUM_QUBITS
    hamiltonian = list(ham_key)
    nh = len(hamiltonian)
    weights = [float(w) for w, _ in hamiltonian]
    flags = [tuple(bool(b) for b in f) for _, f in hamiltonian]
    for f in flags:
        assert len(f) == nq, "Invalid hamiltonian structure"

    # NOTE: the torch code enumerates `num_states` Gray codes (not 2**num_states);
    # we reproduce that behaviour exactly.
    num_states = 2 * depth * (nh + 1)
    assert num_states <= _LANES, "configurations must fit the 128-lane axis"
    k_rows = _round_up(num_states, 8)            # sublane-padded rows of the bit table

    # factor-k metadata (which parameter, which edge weight, beta-or-gamma, which term)
    is_beta = np.zeros(num_states, bool)
    param_idx = np.zeros(num_states, np.int32)
    edge_w = np.ones(num_states, np.float32)
    term_of = np.full(num_states, -1, np.int32)
    for half in range(2):
        for slot in range(depth):
            d_eff = (depth - 1 - slot) if half == 0 else slot   # first half reverses params
            base = half * depth * (nh + 1) + slot * (nh + 1)
            is_beta[base] = True
            param_idx[base] = d_eff
            for j in range(nh):
                k = base + 1 + j
                param_idx[k] = d_eff
                edge_w[k] = weights[j]
                term_of[k] = j

    # Transposed Gray-code bit table (factor k on sublanes, configuration i on lanes)
    # and the fully-static complex coefficient per configuration, packed as a (128,128)
    # matmul operand: column 0 = Re, column 1 = Im, everything else zero.
    bitsT = np.zeros((k_rows, _LANES), np.float32)
    coef = np.zeros((_LANES, _LANES), np.float32)
    phase_lut = (1.0 + 0.0j, -1.0j, -1.0 + 0.0j, 1.0j)   # (-1j) ** m
    for i in range(num_states):
        gcode = i ^ (i >> 1)                      # the Gray code the torch loop walks
        bvec = [(gcode >> k) & 1 for k in range(num_states)]
        for k in range(num_states):
            bitsT[k, i] = float(bvec[k])

        # A set "beta" factor applies the Pauli-X pattern elementwise -> all diagonals 0.
        if any(bvec[k] and is_beta[k] for k in range(num_states)):
            continue                              # coefficient stays 0

        pop = sum(bvec)                           # every set bit contributes (-1j)
        phase = phase_lut[(nq * pop) % 4]

        # Parity of Pauli-Z applications per qubit (set gamma bits apply Z on their edge).
        parity = [0] * nq
        for k in range(num_states):
            if bvec[k] and not is_beta[k]:
                j = int(term_of[k])
                for n in range(nq):
                    if flags[j][n]:
                        parity[n] ^= 1

        # Per-term trace: prod_n 0.5*(1 + sign_g*sign_f) is 1 iff parities match the
        # term's initial Z pattern, else 0.  Fold the term weights right here.
        wsum = 0.0
        for h in range(nh):
            if all(parity[n] == int(flags[h][n]) for n in range(nq)):
                wsum += weights[h]

        cval = phase * wsum
        coef[i, 0] = np.float32(cval.real)
        coef[i, 1] = np.float32(cval.imag)

    active_cols = tuple(k for k in range(num_states) if bitsT[k, :num_states].any())
    passive_cols = tuple(k for k in range(num_states) if k not in set(active_cols))

    return dict(num_states=num_states, k_rows=k_rows,
                bitsT=bitsT, coef=coef,
                active_cols=active_cols, passive_cols=passive_cols,
                is_beta=is_beta, param_idx=param_idx, edge_w=edge_w)


@functools.lru_cache(maxsize=None)
def _get_runner(ham_key, batch: int, tile_b: int):
    """Cached (tables + device arrays + pallas_call + jit) runner per (hamiltonian, batch)."""
    tbl = _build_static_tables(ham_key)
    num_states, k_rows = tbl["num_states"], tbl["k_rows"]

    tb = max(8, min(tile_b, _round_up(batch, 8)))   # sublane multiple; big batches tile at tile_b
    b_pad = _round_up(batch, tb)
    n_steps = b_pad // tb                            # >= 2 for large batches -> both v7x TCs

    kernel = functools.partial(
        _qaoa_kernel, num_qubits=_NUM_QUBITS,
        active_cols=tbl["active_cols"], passive_cols=tbl["passive_cols"])

    call = pl.pallas_call(
        kernel,
        out_shape=jax.ShapeDtypeStruct((b_pad, _LANES), jnp.float32),
        grid=(n_steps,),
        in_specs=[
            pl.BlockSpec((tb, _LANES), lambda b: (b, 0)),        # per-batch angles
            pl.BlockSpec((k_rows, _LANES), lambda b: (0, 0)),    # shared static bit table
            pl.BlockSpec((_LANES, _LANES), lambda b: (0, 0)),    # shared static coefficients
        ],
        out_specs=pl.BlockSpec((tb, _LANES), lambda b: (b, 0)),
        compiler_params=pltpu.CompilerParams(dimension_semantics=("parallel",)),
    )

    # Device-resident static tables (built once per hamiltonian, reused across calls).
    bits_dev = jnp.asarray(tbl["bitsT"])
    coef_dev = jnp.asarray(tbl["coef"])
    pidx = jnp.asarray(tbl["param_idx"])
    edge_w = jnp.asarray(tbl["edge_w"])
    is_beta = jnp.asarray(tbl["is_beta"])

    @jax.jit
    def run(betas, gammas):
        betas = betas.astype(jnp.float32)
        gammas = gammas.astype(jnp.float32)
        # angles depend on the learnable beta/gamma parameters -> thin jnp glue
        theta = jnp.where(is_beta[None, :], betas[:, pidx], gammas[:, pidx] * edge_w[None, :])
        angles = jnp.zeros((b_pad, _LANES), jnp.float32).at[:batch, :num_states].set(theta)
        out = call(angles, bits_dev, coef_dev)
        return jax.lax.complex(out[:batch, 0], out[:batch, 1])    # complex64 (batch,)

    return run


def qaoa_forward_batched(betas, gammas,
                         hamiltonian: List[Tuple[float, Tuple[bool, ...]]],
                         tile_b: int = _DEFAULT_TILE_B):
    """Evaluate B parameter sets in one pallas_call; returns complex64 of shape (B,)."""
    betas = jnp.asarray(betas, jnp.float32)
    gammas = jnp.asarray(gammas, jnp.float32)
    assert betas.ndim == 2 and betas.shape == gammas.shape
    assert betas.shape[1] == _QAOA_DEPTH
    run = _get_runner(_ham_key(hamiltonian), int(betas.shape[0]), int(tile_b))
    return run(betas, gammas)


def qaoa_forward(beta_params, gamma_params,
                 hamiltonian: List[Tuple[float, Tuple[bool, ...]]]):
    """Equivalent of QAOA.forward(hamiltonian); returns a complex64 scalar."""
    return qaoa_forward_batched(jnp.asarray(beta_params)[None, :],
                                jnp.asarray(gamma_params)[None, :], hamiltonian)[0]


# TODO(synk): QAOA.get_optimal_state is an empty stub in the torch module; not implemented.


def _qaoa_reference(beta, gamma, hamiltonian):
    """Literal numpy transcription of the torch module (for a self-check)."""
    depth, nq = _QAOA_DEPTH, _NUM_QUBITS
    eye = np.eye(2, dtype=np.complex64)
    pz = np.array([[1.0, 0.0], [0.0, -1.0]], dtype=np.complex64)
    px = np.array([[0.0, 1.0], [1.0, 0.0]], dtype=np.complex64)
    uni = np.full((2, 2), 0.5, dtype=np.complex64)
    nh = len(hamiltonian)
    num_states = 2 * depth * (nh + 1)
    trace = 0.0 + 0.0j
    for weight, flags in hamiltonian:
        ret = [False] * num_states
        for i in range(num_states):
            if i != 0:
                ind = int(np.log2(i & ~(i - 1)))
                ret[ind] = not ret[ind]
            ring = [pz.copy() if flags[n] else eye.copy() for n in range(nq)]

            def apply_half(first_half):
                ind0 = 0 if first_half else depth * (nh + 1)
                for s in range(depth):
                    d = (depth - 1 - s) if first_half else s
                    base = ind0 + s * (nh + 1)
                    mult = (-1j * np.sin(beta[d]) * px) if ret[base] else np.cos(beta[d])
                    for n in range(nq):
                        ring[n] = ring[n] * mult
                    for j in range(nh):
                        ew, hflags = hamiltonian[j]
                        theta = gamma[d] * ew
                        mult = (-1j * np.sin(theta)) if ret[base + 1 + j] else np.cos(theta)
                        for n in range(nq):
                            ring[n] = ring[n] * mult
                        if ret[base + 1 + j]:
                            for n in range(nq):
                                if hflags[n]:
                                    ring[n] = ring[n] * pz

            apply_half(True)
            for n in range(nq):
                ring[n] = ring[n] * uni
            apply_half(False)
            temp = 1.0 + 0.0j
            for mat in ring:
                temp = temp * np.trace(mat)
            trace = trace + weight * temp
    return complex(trace)


if __name__ == "__main__":
    key = jax.random.PRNGKey(0)
    kb, kg = jax.random.split(key)
    # deterministic init of the module's parameters (torch: randn(_QAOA_DEPTH))
    beta = jax.random.normal(kb, (_QAOA_DEPTH,), dtype=jnp.float32)
    gamma = jax.random.normal(kg, (_QAOA_DEPTH,), dtype=jnp.float32)

    # small ring-graph ZZ Hamiltonian on 4 qubits: 4 terms, each flags 2 qubits
    hamiltonian = [
        (1.0,  (True, True, False, False)),
        (0.5,  (False, True, True, False)),
        (-0.75, (False, False, True, True)),
        (1.25, (True, False, False, True)),
    ]

    # single-parameter-set forward (matches QAOA.forward)
    result = jax.block_until_ready(qaoa_forward(beta, gamma, hamiltonian))
    ref = _qaoa_reference(np.asarray(beta), np.asarray(gamma), hamiltonian)
    got = complex(np.asarray(result))
    assert np.allclose(got, ref, rtol=2e-3, atol=2e-3), (got, ref)

    # batched path: B parameter sets in one pallas_call (batch lives on the sublane axis)
    betas = jnp.stack([beta, gamma])
    gammas = jnp.stack([gamma, beta])
    batched = jax.block_until_ready(qaoa_forward_batched(betas, gammas, hamiltonian))
    for b in range(2):
        refb = _qaoa_reference(np.asarray(betas[b]), np.asarray(gammas[b]), hamiltonian)
        gotb = complex(np.asarray(batched[b]))
        assert np.allclose(gotb, refb, rtol=2e-3, atol=2e-3), (b, gotb, refb)

    # second call with the same hamiltonian/batch shape: hits the cached jitted runner
    _ = jax.block_until_ready(qaoa_forward_batched(betas, gammas, hamiltonian))

    print("KERNEL_OK")
</pallas_src>

<mosaic_0001>
module attributes {stable_mosaic.version = 11 : i64} {
  func.func @_qaoa_kernel(%arg0: i32, %arg1: memref<8x128xf32, #tpu.memory_space<vmem>>, %arg2: memref<24x128xf32, #tpu.memory_space<vmem>>, %arg3: memref<128x128xf32, #tpu.memory_space<vmem>>, %arg4: memref<8x128xf32, #tpu.memory_space<vmem>>) attributes {dimension_semantics = [#tpu.dimension_semantics<parallel>], iteration_bounds = array<i64: 1>, scalar_prefetch = 0 : i64, scratch_operands = 0 : i64, tpu.core_type = #tpu.core_type<tc>, window_params = [{transform_indices = @transform_0, window_bounds = array<i64: 8, 128>}, {pipeline_mode = #tpu.pipeline_mode<synchronous>, transform_indices = @transform_1, window_bounds = array<i64: 24, 128>}, {pipeline_mode = #tpu.pipeline_mode<synchronous>, transform_indices = @transform_2, window_bounds = array<i64: 128, 128>}, {transform_indices = @transform_3, window_bounds = array<i64: 8, 128>}]} {
    %c0 = arith.constant 0 : index
    %c0_0 = arith.constant 0 : index
    %0 = vector.load %arg1[%c0, %c0_0] : memref<8x128xf32, #tpu.memory_space<vmem>>, vector<8x128xf32>
    %1 = math.sin %0 : vector<8x128xf32>
    %2 = math.cos %0 : vector<8x128xf32>
    %3 = vector.extract_strided_slice %2 {offsets = [0, 5], sizes = [8, 1], strides = [1, 1]} : vector<8x128xf32> to vector<8x1xf32>
    %4 = vector.extract_strided_slice %2 {offsets = [0, 6], sizes = [8, 1], strides = [1, 1]} : vector<8x128xf32> to vector<8x1xf32>
    %5 = arith.mulf %3, %4 : vector<8x1xf32>
    %6 = vector.extract_strided_slice %2 {offsets = [0, 7], sizes = [8, 1], strides = [1, 1]} : vector<8x128xf32> to vector<8x1xf32>
    %7 = arith.mulf %5, %6 : vector<8x1xf32>
    %8 = vector.extract_strided_slice %2 {offsets = [0, 8], sizes = [8, 1], strides = [1, 1]} : vector<8x128xf32> to vector<8x1xf32>
    %9 = arith.mulf %7, %8 : vector<8x1xf32>
    %10 = vector.extract_strided_slice %2 {offsets = [0, 9], sizes = [8, 1], strides = [1, 1]} : vector<8x128xf32> to vector<8x1xf32>
    %11 = arith.mulf %9, %10 : vector<8x1xf32>
    %12 = vector.extract_strided_slice %2 {offsets = [0, 10], sizes = [8, 1], strides = [1, 1]} : vector<8x128xf32> to vector<8x1xf32>
    %13 = arith.mulf %11, %12 : vector<8x1xf32>
    %14 = vector.extract_strided_slice %2 {offsets = [0, 11], sizes = [8, 1], strides = [1, 1]} : vector<8x128xf32> to vector<8x1xf32>
    %15 = arith.mulf %13, %14 : vector<8x1xf32>
    %16 = vector.extract_strided_slice %2 {offsets = [0, 12], sizes = [8, 1], strides = [1, 1]} : vector<8x128xf32> to vector<8x1xf32>
    %17 = arith.mulf %15, %16 : vector<8x1xf32>
    %18 = vector.extract_strided_slice %2 {offsets = [0, 13], sizes = [8, 1], strides = [1, 1]} : vector<8x128xf32> to vector<8x1xf32>
    %19 = arith.mulf %17, %18 : vector<8x1xf32>
    %20 = vector.extract_strided_slice %2 {offsets = [0, 14], sizes = [8, 1], strides = [1, 1]} : vector<8x128xf32> to vector<8x1xf32>
    %21 = arith.mulf %19, %20 : vector<8x1xf32>
    %22 = vector.extract_strided_slice %2 {offsets = [0, 15], sizes = [8, 1], strides = [1, 1]} : vector<8x128xf32> to vector<8x1xf32>
    %23 = arith.mulf %21, %22 : vector<8x1xf32>
    %24 = vector.extract_strided_slice %2 {offsets = [0, 16], sizes = [8, 1], strides = [1, 1]} : vector<8x128xf32> to vector<8x1xf32>
    %25 = arith.mulf %23, %24 : vector<8x1xf32>
    %26 = vector.extract_strided_slice %2 {offsets = [0, 17], sizes = [8, 1], strides = [1, 1]} : vector<8x128xf32> to vector<8x1xf32>
    %27 = arith.mulf %25, %26 : vector<8x1xf32>
    %28 = vector.extract_strided_slice %2 {offsets = [0, 18], sizes = [8, 1], strides = [1, 1]} : vector<8x128xf32> to vector<8x1xf32>
    %29 = arith.mulf %27, %28 : vector<8x1xf32>
    %30 = vector.extract_strided_slice %2 {offsets = [0, 19], sizes = [8, 1], strides = [1, 1]} : vector<8x128xf32> to vector<8x1xf32>
    %31 = arith.mulf %29, %30 : vector<8x1xf32>
    %32 = vector.extract_strided_slice %2 {offsets = [0, 0], sizes = [8, 1], strides = [1, 1]} : vector<8x128xf32> to vector<8x1xf32>
    %33 = vector.extract_strided_slice %1 {offsets = [0, 0], sizes = [8, 1], strides = [1, 1]} : vector<8x128xf32> to vector<8x1xf32>
    %c0_1 = arith.constant 0 : index
    %c0_2 = arith.constant 0 : index
    %34 = vector.load %arg2[%c0_1, %c0_2] : memref<24x128xf32, #tpu.memory_space<vmem>>, vector<1x128xf32>
    %35 = arith.subf %33, %32 : vector<8x1xf32>
    %36 = vector.broadcast %34 : vector<1x128xf32> to vector<8x128xf32>
    %37 = vector.broadcast %35 : vector<8x1xf32> to vector<8x128xf32>
    %38 = arith.mulf %36, %37 : vector<8x128xf32>
    %39 = vector.broadcast %32 : vector<8x1xf32> to vector<8x128xf32>
    %40 = arith.addf %39, %38 : vector<8x128xf32>
    %41 = vector.extract_strided_slice %2 {offsets = [0, 1], sizes = [8, 1], strides = [1, 1]} : vector<8x128xf32> to vector<8x1xf32>
    %42 = vector.extract_strided_slice %1 {offsets = [0, 1], sizes = [8, 1], strides = [1, 1]} : vector<8x128xf32> to vector<8x1xf32>
    %c1 = arith.constant 1 : index
    %c0_3 = arith.constant 0 : index
    %43 = vector.load %arg2[%c1, %c0_3] : memref<24x128xf32, #tpu.memory_space<vmem>>, vector<1x128xf32>
    %44 = arith.subf %42, %41 : vector<8x1xf32>
    %45 = vector.broadcast %43 : vector<1x128xf32> to vector<8x128xf32>
    %46 = vector.broadcast %44 : vector<8x1xf32> to vector<8x128xf32>
    %47 = arith.mulf %45, %46 : vector<8x128xf32>
    %48 = vector.broadcast %41 : vector<8x1xf32> to vector<8x128xf32>
    %49 = arith.addf %48, %47 : vector<8x128xf32>
    %50 = arith.mulf %40, %49 : vector<8x128xf32>
    %51 = vector.extract_strided_slice %2 {offsets = [0, 2], sizes = [8, 1], strides = [1, 1]} : vector<8x128xf32> to vector<8x1xf32>
    %52 = vector.extract_strided_slice %1 {offsets = [0, 2], sizes = [8, 1], strides = [1, 1]} : vector<8x128xf32> to vector<8x1xf32>
    %c2 = arith.constant 2 : index
    %c0_4 = arith.constant 0 : index
    %53 = vector.load %arg2[%c2, %c0_4] : memref<24x128xf32, #tpu.memory_space<vmem>>, vector<1x128xf32>
    %54 = arith.subf %52, %51 : vector<8x1xf32>
    %55 = vector.broadcast %53 : vector<1x128xf32> to vector<8x128xf32>
    %56 = vector.broadcast %54 : vector<8x1xf32> to vector<8x128xf32>
    %57 = arith.mulf %55, %56 : vector<8x128xf32>
    %58 = vector.broadcast %51 : vector<8x1xf32> to vector<8x128xf32>
    %59 = arith.addf %58, %57 : vector<8x128xf32>
    %60 = arith.mulf %50, %59 : vector<8x128xf32>
    %61 = vector.extract_strided_slice %2 {offsets = [0, 3], sizes = [8, 1], strides = [1, 1]} : vector<8x128xf32> to vector<8x1xf32>
    %62 = vector.extract_strided_slice %1 {offsets = [0, 3], sizes = [8, 1], strides = [1, 1]} : vector<8x128xf32> to vector<8x1xf32>
    %c3 = arith.constant 3 : index
    %c0_5 = arith.constant 0 : index
    %63 = vector.load %arg2[%c3, %c0_5] : memref<24x128xf32, #tpu.memory_space<vmem>>, vector<1x128xf32>
    %64 = arith.subf %62, %61 : vector<8x1xf32>
    %65 = vector.broadcast %63 : vector<1x128xf32> to vector<8x128xf32>
    %66 = vector.broadcast %64 : vector<8x1xf32> to vector<8x128xf32>
    %67 = arith.mulf %65, %66 : vector<8x128xf32>
    %68 = vector.broadcast %61 : vector<8x1xf32> to vector<8x128xf32>
    %69 = arith.addf %68, %67 : vector<8x128xf32>
    %70 = arith.mulf %60, %69 : vector<8x128xf32>
    %71 = vector.extract_strided_slice %2 {offsets = [0, 4], sizes = [8, 1], strides = [1, 1]} : vector<8x128xf32> to vector<8x1xf32>
    %72 = vector.extract_strided_slice %1 {offsets = [0, 4], sizes = [8, 1], strides = [1, 1]} : vector<8x128xf32> to vector<8x1xf32>
    %c4 = arith.constant 4 : index
    %c0_6 = arith.constant 0 : index
    %73 = vector.load %arg2[%c4, %c0_6] : memref<24x128xf32, #tpu.memory_space<vmem>>, vector<1x128xf32>
    %74 = arith.subf %72, %71 : vector<8x1xf32>
    %75 = vector.broadcast %73 : vector<1x128xf32> to vector<8x128xf32>
    %76 = vector.broadcast %74 : vector<8x1xf32> to vector<8x128xf32>
    %77 = arith.mulf %75, %76 : vector<8x128xf32>
    %78 = vector.broadcast %71 : vector<8x1xf32> to vector<8x128xf32>
    %79 = arith.addf %78, %77 : vector<8x128xf32>
    %80 = arith.mulf %70, %79 : vector<8x128xf32>
    %81 = vector.broadcast %31 : vector<8x1xf32> to vector<8x128xf32>
    %82 = arith.mulf %80, %81 : vector<8x128xf32>
    %83 = arith.mulf %82, %82 : vector<8x128xf32>
    %84 = arith.mulf %83, %83 : vector<8x128xf32>
    %c0_7 = arith.constant 0 : index
    %c0_8 = arith.constant 0 : index
    %85 = vector.load %arg3[%c0_7, %c0_8] : memref<128x128xf32, #tpu.memory_space<vmem>>, vector<128x128xf32>
    %cst = arith.constant dense<0.000000e+00> : vector<8x128xf32>
    %86 = tpu.matmul %84, %85, %cst {dimension_numbers = #tpu.dot_dimension_numbers<[1], [0], [0], [1], [0, 0, 1, 1], [], []>} : vector<8x128xf32>, vector<128x128xf32>, vector<8x128xf32> -> vector<8x128xf32>
    %c0_9 = arith.constant 0 : index
    %c0_10 = arith.constant 0 : index
    %87 = vector.load %arg4[%c0_9, %c0_10] : memref<8x128xf32, #tpu.memory_space<vmem>>, vector<8x128xf32>
    tpu.vector_store %arg4[%c0_9, %c0_10], %86 {strides = array<i32>} : memref<8x128xf32, #tpu.memory_space<vmem>>, vector<8x128xf32>,
    return
  }
  func.func @transform_0(%arg0: i32) -> (i32, i32) {
    %c0_i32 = arith.constant 0 : i32
    %c0_i32_0 = arith.constant 0 : i32
    return %arg0, %c0_i32 : i32, i32
  }
  func.func @transform_1(%arg0: i32) -> (i32, i32) {
    %c0_i32 = arith.constant 0 : i32
    %c0_i32_0 = arith.constant 0 : i32
    %c0_i32_1 = arith.constant 0 : i32
    return %c0_i32, %c0_i32_0 : i32, i32
  }
  func.func @transform_2(%arg0: i32) -> (i32, i32) {
    %c0_i32 = arith.constant 0 : i32
    %c0_i32_0 = arith.constant 0 : i32
    %c0_i32_1 = arith.constant 0 : i32
    return %c0_i32, %c0_i32_0 : i32, i32
  }
  func.func @transform_3(%arg0: i32) -> (i32, i32) {
    %c0_i32 = arith.constant 0 : i32
    %c0_i32_0 = arith.constant 0 : i32
    return %arg0, %c0_i32 : i32, i32
  }
}

</mosaic_0001>

<bundles_post_ra>
// kernel: custom-call
= control target key start
LH: loop header
LB: loop body
LE: loop exit
PB: predicated region body
PF: predicated region fallthrough
CT: control target
= control target key end

     0   :  { %vm5_vm0 = vcmask 1040384   ;;  %s108_s0 = inlined_call_operand.<no memory space> [shape: f32[1], index: 0, kind: input, shape index: {}]   ;;  %s109_s1 = inlined_call_operand.<no memory space> [shape: f32[1], index: 1, kind: input, shape index: {}]   ;;  %s110_s2 = inlined_call_operand.hbm [shape: c64[1], index: 2, kind: output, shape index: {}]  }
   0x1   :  { %s3_s11 = scalar_lea.hbm %s110_s2, 16  ;;  %v4_v0 = vstv %s108_s0 }
   0x2   :  { %6 = vst.msk [vmem:[#allocation0] sm:$0xff] %vm5_vm0, %v4_v0 }
   0x3   :  { %7 = vsyncpa [#allocation1], 0  ;;  %s73_s14 = smov [#allocation0]  }
   0x4   :  { %s8_s15 = sshll.u32 %s73_s14, 4  ;;  %s9_s15 = int_to_ptr.vmem [resolvable:$true] %s8_s15 }
   0x5   :  { %s26_s16 = scalar_lea.vmem %s9_s15, 16  ;;  %s30_s17 = scalar_lea.vmem %s9_s15, 128 }
   0x6   :  { %p27_p0 = scmp.ne.s32.totalorder %s9_s15, %s26_s16  ;;  %p31_p1 = scmp.lt.s32.totalorder %s9_s15, %s9_s15 }
   0x7   :  { %p32_p2 = scmp.lt.s32.totalorder %s30_s17, %s26_s16 }
   0x9   :  { %p33_p3 = por %p32_p2, %p31_p1 }
   0xb   :  { %p34_p4 = pnand %p33_p3, %p27_p0 }
   0xd   :  { %37 = shalt.err (!%p34_p4)  }
   0xe   :  { %11 = dma.vmem_to_hbm [thread:$0]  %s9_s15, 16, %s110_s2, [#allocation1] }
   0xf   :  { %69 = dma.done.wait [#allocation1], 16  }
  0x10   :  { %70 = vsyncadd [#allocation1], 4294967280 }
  0x11   :  { %13 = vsyncpa [#allocation1], 1  ;;  %v14_v1 = vstv %s109_s1 }
  0x12   :  { %16 = vst.msk [vmem:[#allocation2] sm:$0xff] %vm5_vm0, %v14_v1 }
  0x13   :  { %17 = vsyncpa [#allocation3], 0  ;;  %s74_s21 = smov [#allocation2]  }
  0x14   :  { %s18_s22 = sshll.u32 %s74_s21, 4  ;;  %s19_s22 = int_to_ptr.vmem [resolvable:$true] %s18_s22 }
  0x15   :  { %s46_s23 = scalar_lea.vmem %s19_s22, 16  ;;  %s50_s24 = scalar_lea.vmem %s19_s22, 128 }
  0x16   :  { %p47_p5 = scmp.ne.s32.totalorder %s19_s22, %s46_s23  ;;  %p51_p6 = scmp.lt.s32.totalorder %s19_s22, %s19_s22 }
  0x17   :  { %p52_p7 = scmp.lt.s32.totalorder %s50_s24, %s46_s23 }
  0x19   :  { %p53_p8 = por %p52_p7, %p51_p6 }
  0x1b   :  { %p54_p9 = pnand %p53_p8, %p47_p5 }
  0x1d   :  { %57 = shalt.err (!%p54_p9)  }
  0x1e   :  { %21 = dma.vmem_to_hbm [thread:$0]  %s19_s22, 16, %s3_s11, [#allocation3] }
  0x1f   :  { %71 = dma.done.wait [#allocation3], 16  }
  0x20   :  { %72 = vsyncadd [#allocation3], 4294967280 }
  0x21   :  { %23 = vsyncpa [#allocation3], 1 }

// kernel: run.1
= control target key start
LH: loop header
LB: loop body
LE: loop exit
PB: predicated region body
PF: predicated region fallthrough
CT: control target
= control target key end

     0   :  { %8 = vsyncpa [#allocation3], 0  ;;  %s612_s12 = smov [#allocation2]   ;;  %s756_s0 = inlined_call_operand.vmem [shape: f32[8,128], index: 0, kind: input, shape index: {}]   ;;  %s757_s1 = inlined_call_operand.vmem [shape: f32[24,128], index: 1, kind: input, shape index: {}]   ;;  %s758_s2 = inlined_call_operand.hbm [shape: f32[128,128], index: 2, kind: input, shape index: {}]   ;;  %s759_s3 = inlined_call_operand.vmem [shape: f32[8,128], index: 3, kind: output, shape index: {}]  }
   0x1   :  { %s18_s13 = sshll.u32 %s612_s12, 4  ;;  %s19_s13 = int_to_ptr.vmem [resolvable:$true] %s18_s13 }
   0x2   :  { %s598_s14 = scalar_lea.vmem %s19_s13, 2048  ;;  %p603_p1 = scmp.lt.s32.totalorder %s19_s13, %s19_s13 }
   0x3   :  { %p599_p0 = scmp.ne.s32.totalorder %s19_s13, %s598_s14  ;;  %p604_p2 = scmp.lt.s32.totalorder %s598_s14, %s598_s14 }
   0x5   :  { %p605_p3 = por %p604_p2, %p603_p1 }
   0x7   :  { %p606_p4 = pnand %p605_p3, %p599_p0 }
   0x9   :  { %609 = shalt.err (!%p606_p4)
}
   0xa   :  { %s613_s15 = smov 128   ;;  %s614_s16 = smov 8  }
   0xb   :  { %24 = dma.hbm_to_vmem [thread:$0]  %s758_s2, 2048, %s19_s13, [#allocation3], %s613_s15, %s613_s15, %s614_s16  }
   0xc   :  { %610 = dma.done.wait [#allocation3], 2048  }
   0xd   :  { %611 = vsyncadd [#allocation3], 4294965248  ;;  %v615_v0 = vmov 0   ;;  %v616_v1 = vmov 1   ;;  %v671_v2 = vld [vmem:[%s756_s0] sm:$0xff]  ;;  %s623_s0 = smov 127  }
   0xe   :  { %574 = vset.pattern.permute.xlu1 %v615_v0  ;;  %575 = vset.pattern.permute.xlu0 %v616_v1  ;;  %v32_v3 = vand.u32 2139095040, %v671_v2  ;;  %v29_v5 = vand.u32 2147483647, %v671_v2  ;;  %v617_v14 = vmov 683565275   ;;  %vm31_vm7 = vcmp.lt.s32.totalorder %v671_v2, 0 }
   0xf   :  { %v618_v16 = vmov 2475754826   ;;  %v619_v18 = vmov 2131351028   ;;  %v620_v20 = vmov 2102212464   ;;  %vm121_vm12 = vweird.f32 %v671_v2 }
  0x10   :  { %v33_v4 = vshrl.u32 %v32_v3, 23  ;;  %v36_v8 = vand.u32 8388607, %v29_v5  ;;  %v621_v22 = vmov 920167782   ;;  %s624_s2 = smov 125  }
  0x11   :  { %v622_v29 = vmov 1326507024   ;;  %vm30_vm8 = vcmp.le.f32.partialorder %v29_v5, 0.7853982  ;;  %s625_s21 = smov 126   ;;  %s626_s22 = smov 124  }
  0x12   :  { %v474_v6 = vadd.s32 4294967169, %v33_v4  ;;  %v37_v11 = vor.u32 8388608, %v36_v8  ;;  %s627_s23 = smov 123   ;;  %s628_s24 = smov 122  }
  0x13   :  { %s629_s25 = smov 121   ;;  %s630_s26 = smov 120  }
  0x14   :  { %v39_v7 = vadd.s32 1, %v474_v6  ;;  %v77_v31 = vshll.u32 %v37_v11, 8  ;;  %s631_s27 = smov 119   ;;  %s632_s28 = smov 118  }
  0x15   :  { %s633_s29 = smov 117   ;;  %s634_s30 = smov 116  }
  0x16   :  { %vm40_vm0 = vcmp.gt.s32.totalorder %v39_v7, 0  ;;  %s635_s4 = smov 115   ;;  %s636_s5 = smov 114  }
  0x17   :  { %v41_v9 = vsel %vm40_vm0, %v39_v7, 0  ;;  %vm642_vm0 = vmmov 0  }
  0x18   :  { %v43_v10 = vand.u32 31, %v41_v9  ;;  %v42_v12 = vshrl.u32 %v41_v9, 5 }
  0x1a   :  { %v44_v13 = vsub.s32 32, %v43_v10  ;;  %v46_v15 = vshll.u32 %v617_v14, %v43_v10  ;;  %v49_v17 = vshll.u32 %v618_v16, %v43_v10  ;;  %v52_v19 = vshll.u32 %v619_v18, %v43_v10 }
  0x1b   :  { %v55_v21 = vshll.u32 %v620_v20, %v43_v10  ;;  %v58_v23 = vshll.u32 %v621_v22, %v43_v10  ;;  %vm61_vm1 = vcmp.lt.s32.totalorder %v42_v12, 1  ;;  %vm64_vm2 = vcmp.lt.s32.totalorder %v42_v12, 4 }
  0x1c   :  { %v45_v24 = vshrl.u32 %v617_v14, %v44_v13  ;;  %v47_v25 = vshrl.u32 %v618_v16, %v44_v13  ;;  %v50_v26 = vshrl.u32 %v619_v18, %v44_v13  ;;  %v53_v27 = vshrl.u32 %v620_v20, %v44_v13 }
  0x1d   :  { %v56_v28 = vshrl.u32 %v621_v22, %v44_v13  ;;  %v59_v30 = vshrl.u32 %v622_v29, %v44_v13  ;;  %vm62_vm3 = vcmp.lt.s32.totalorder %v42_v12, 2  ;;  %vm63_vm4 = vcmp.lt.s32.totalorder %v42_v12, 3 }
  0x1e   :  { %v48_v32 = vor.u32 %v47_v25, %v46_v15  ;;  %v51_v33 = vor.u32 %v50_v26, %v49_v17  ;;  %v54_v34 = vor.u32 %v53_v27, %v52_v19 }
  0x1f   :  { %v57_v35 = vor.u32 %v56_v28, %v55_v21  ;;  %v60_v36 = vor.u32 %v59_v30, %v58_v23 }
  0x20   :  { %v65_v37 = vsel %vm61_vm1, %v45_v24, %v48_v32  ;;  %v66_v38 = vsel %vm64_vm2, %v54_v34, 2102212464  ;;  %v69_v39 = vsel %vm61_vm1, %v48_v32, %v51_v33  ;;  %v73_v40 = vsel %vm61_vm1, %v51_v33, %v54_v34 }
  0x21   :  { %v67_v41 = vsel %vm63_vm4, %v51_v33, %v66_v38  ;;  %v70_v42 = vsel %vm64_vm2, %v57_v35, 920167782  ;;  %v74_v43 = vsel %vm64_vm2, %v60_v36, 1326507024 }
  0x22   :  { %v71_v44 = vsel %vm63_vm4, %v54_v34, %v70_v42  ;;  %v75_v45 = vsel %vm63_vm4, %v57_v35, %v74_v43  ;;  %v68_v46 = vsel %vm62_vm3, %v65_v37, %v67_v41  ;;  %v639_v41 = vmov 4   ;;  %v397_v42 = vld [vmem:[#allocation2 + $0x78] sm:$0xff]  ;;  %v396_v43 = vld [vmem:[#allocation2 + $0x70] sm:$0xff] }
  0x23   :  { %v72_v47 = vsel %vm62_vm3, %v69_v39, %v71_v44  ;;  %v76_v48 = vsel %vm62_vm3, %v73_v40, %v75_v45  ;;  %v84_v53 = vmul.u32 %v77_v31, %v68_v46  ;;  %v637_v39 = vmov 2   ;;  %v394_v44 = vld [vmem:[#allocation2 + $0x60] sm:$0xff]  ;;  %v393_v45 = vld [vmem:[#allocation2 + $0x58] sm:$0xff]  ;;  %v392_v46 = vld [vmem:[#allocation2 + $0x50] sm:$0xff] }
  0x24   :  { %v677_v49 = vmul.u32.u64.low %v77_v31, %v76_v48  ;;  %v678_v50 = vmul.u32.u64.high %v77_v31, %v76_v48, %v677_v49  ;;  %v680_v51 = vmul.u32.u64.low %v77_v31, %v72_v47  ;;  %v681_v52 = vmul.u32.u64.high %v77_v31, %v72_v47, %v680_v51  ;;  %v391_v47 = vld [vmem:[#allocation2 + $0x48] sm:$0xff]  ;;  %v390_v48 = vld [vmem:[#allocation2 + $0x40] sm:$0xff] }
  0x25   :  { %v638_v40 = vmov 3   ;;  %v389_v49 = vld [vmem:[#allocation2 + $0x38] sm:$0xff] }
  0x26   :  { %vm86_vm5 = vc.u32 %v678_v50, %v680_v51  ;;  %v87_v54 = vadd.s32 1, %v681_v52  ;;  %v85_v4 = vadd.s32 %v680_v51, %v678_v50  ;;  %v388_v50 = vld [vmem:[#allocation2 + $0x30] sm:$0xff]  ;;  %v387_v51 = vld [vmem:[#allocation2 + $0x28] sm:$0xff] }
  0x28   :  { %v88_v55 = vsel %vm86_vm5, %v87_v54, %v681_v52  ;;  %v386_v52 = vld [vmem:[#allocation2 + $0x20] sm:$0xff] }
  0x29   :  { %v89_v56 = vadd.s32 %v88_v55, %v84_v53  ;;  %v385_v53 = vld [vmem:[#allocation2 + $0x18] sm:$0xff] }
  0x2b   :  { %v90_v57 = vadd.s32 536870912, %v89_v56 }
  0x2d   :  { %v91_v58 = vshrl.u32 %v90_v57, 30 }
  0x2f   :  { %v92_v59 = vshll.u32 %v91_v58, 30  ;;  %v115_v20 = vsub.s32 4, %v91_v58 }
  0x31   :  { %v93_v60 = vsub.s32 %v89_v56, %v92_v59  ;;  %v116_v22 = vsel %vm31_vm7, %v115_v20, %v91_v58 }
  0x32   :  { %v118_v23 = vsel %vm30_vm8, 0, %v116_v22 }
  0x33   :  { %v95_v61 = vsub.s32 0, %v93_v60  ;;  %v226_v24 = vand.u32 3, %v118_v23  ;;  %v122_v32 = vadd.s32 3, %v118_v23  ;;  %v383_v23 = vld [vmem:[#allocation2 + $0x8] sm:$0xff] }
  0x35   :  { %v475_v62 = vmin.u32 %v95_v61, %v93_v60  ;;  %vm231_vm9 = vcmp.eq.s32.totalorder %v226_v24, 2  ;;  %vm228_vm10 = vcmp.eq.s32.totalorder %v226_v24, 0  ;;  %vm227_vm11 = vcmp.lt.s32.totalorder %v226_v24, 2  ;;  %v382_v24 = vld [vmem:[#allocation2] sm:$0xff] }
  0x36   :  { %v123_v33 = vand.u32 3, %v122_v32 }
  0x37   :  { %v97_v63 = vclz %v475_v62 }
  0x38   :  { %vm125_vm13 = vcmp.eq.s32.totalorder %v123_v33, 0  ;;  %vm128_vm14 = vcmp.eq.s32.totalorder %v123_v33, 2  ;;  %vm124_vm15 = vcmp.lt.s32.totalorder %v123_v33, 2 }
  0x39   :  { %v476_v3 = vadd.s32 4294967294, %v97_v63 }
  0x3b   :  { %vm477_vm6 = vcmp.lt.s32.totalorder %v476_v3, 0 }
  0x3c   :  { %v100_v6 = vsel %vm477_vm6, 0, %v476_v3 }
  0x3d   :  { %v101_v7 = vsub.s32 32, %v100_v6  ;;  %v102_v8 = vshll.u32 %v93_v60, %v100_v6  ;;  %v105_v9 = vsub.s32 4294967266, %v100_v6 }
  0x3f   :  { %v103_v10 = vshrl.u32 %v85_v4, %v101_v7  ;;  %v106_v11 = vadd.s32 127, %v105_v9 }
  0x41   :  { %v104_v12 = vor.u32 %v103_v10, %v102_v8  ;;  %v107_v13 = vshll.u32 %v106_v11, 23 }
  0x43   :  { %v108_v14 = vor.u32 4788187, %v107_v13  ;;  %v111_v15 = vcvt.s32.f32 %v104_v12 }
  0x45   :  { %v109_v16 = vand.u32 2147483647, %v108_v14 }
  0x47   :  { %v112_v17 = vmul.f32 %v111_v15, %v109_v16 }
  0x49   :  { %v113_v18 = vxor.u32 2147483648, %v112_v17 }
  0x4b   :  { %v114_v19 = vsel %vm31_vm7, %v113_v18, %v112_v17 }
  0x4c   :  { %v117_v21 = vsel %vm30_vm8, %v671_v2, %v114_v19  ;;  %v640_v2 = vmov 5  }
  0x4d   :  { %586 = vcosq.f32 %v117_v21 }
  0x4e   :  { %588 = vsinq.f32 %v117_v21  ;;  %v384_v21 = vld [vmem:[#allocation2 + $0x10] sm:$0xff] }
  0x5a   :  { %v587_v25 = vpop.eup %586 }
  0x5b   :  { %v589_v26 = vpop.eup %588  ;;  %v129_v27 = vxor.u32 2147483648, %v587_v25 }
  0x5c   :  { %v126_v28 = vxor.u32 2147483648, %v589_v26 }
  0x5d   :  { %v233_v5 = vsel %vm231_vm9, %v129_v27, %v589_v26  ;;  %v130_v35 = vsel %vm128_vm14, %v129_v27, %v589_v26 }
  0x5e   :  { %v230_v29 = vsel %vm228_vm10, %v587_v25, %v126_v28  ;;  %v127_v34 = vsel %vm125_vm13, %v587_v25, %v126_v28 }
  0x5f   :  { %v234_v30 = vsel %vm227_vm11, %v230_v29, %v233_v5  ;;  %v131_v36 = vsel %vm124_vm15, %v127_v34, %v130_v35  ;;  %v483_v29 = vld [vmem:[%s757_s1 + $0x1] ss:$0 sm:$0xff]  ;;  %v484_v34 = vld [vmem:[%s757_s1 + $0x2] ss:$0 sm:$0xff] }
  0x60   :  { %v694_v31 = vsel %vm121_vm12, nan, %v234_v30  ;;  %v132_v37 = vsel %vm121_vm12, nan, %v131_v36  ;;  %v482_v30 = vld [vmem:[%s757_s1] ss:$0 sm:$0xff] }
  0x61   :  { %237 = vrot.lane.b32.xlu0 %v694_v31, %s623_s0  ;;  %245 = vrot.lane.b32.xlu1 %v694_v31, %s624_s2  ;;  %v294_v38 = vsub.f32 %v132_v37, %v694_v31 }
  0x65   :  { %241 = vrot.lane.b32.xlu0 %v694_v31, %s625_s21  ;;  %249 = vrot.lane.b32.xlu1 %v694_v31, %s626_s22 }
  0x69   :  { %253 = vrot.lane.b32.xlu0 %v694_v31, %s627_s23  ;;  %257 = vrot.lane.b32.xlu1 %v694_v31, %s628_s24 }
  0x6d   :  { %261 = vrot.lane.b32.xlu0 %v694_v31, %s629_s25  ;;  %265 = vrot.lane.b32.xlu1 %v694_v31, %s630_s26 }
  0x71   :  { %269 = vrot.lane.b32.xlu0 %v694_v31, %s631_s27  ;;  %273 = vrot.lane.b32.xlu1 %v694_v31, %s632_s28 }
  0x75   :  { %277 = vrot.lane.b32.xlu0 %v694_v31, %s633_s29  ;;  %281 = vrot.lane.b32.xlu1 %v694_v31, %s634_s30 }
  0x79   :  { %285 = vrot.lane.b32.xlu0 %v694_v31, %s635_s4  ;;  %289 = vrot.lane.b32.xlu1 %v694_v31, %s636_s5 }
  0x7d   :  { %306 = vperm.xlu1 %574, %v694_v31   ;;  %321 = vperm.xlu0 %575, %v694_v31  }
  0x81   :  { %576 = vset.pattern.permute.xlu1 %v637_v39  ;;  %578 = vset.pattern.permute.xlu0 %v615_v0  ;;  %v641_v0 = vmov 0.0  }
  0x82   :  { %337 = vperm.xlu1 %576, %v694_v31   ;;  %301 = vperm.xlu0 %578, %v294_v38  }
  0x83   :  { %504 = vmatprep.subr.mxu0 %v641_v0  ;;  %536 = vmatprep.mubr.msk.f32.mxu0 %vm642_vm0, %v641_v0 }
  0x84   :  { %505 = vmatpush3.msra.mxu0 %v397_v42  ;;  %v486_v42 = vld [vmem:[%s757_s1 + $0x4] ss:$0 sm:$0xff] }
  0x85   :  { %506 = vmatprep.subr.mxu0 %v641_v0 }
  0x86   :  { %577 = vset.pattern.permute.xlu1 %v638_v40  ;;  %581 = vset.pattern.permute.xlu0 %v638_v40 }
  0x87   :  { %353 = vperm.xlu1 %577, %v694_v31   ;;  %348 = vperm.xlu0 %581, %v294_v38  }
  0x88   :  { %507 = vmatpush3.msra.mxu0 %v396_v43 }
  0x89   :  { %508 = vmatprep.subr.mxu0 %v641_v0 }
  0x8b   :  { %579 = vset.pattern.permute.xlu1 %v616_v1  ;;  %583 = vset.pattern.permute.xlu0 %v639_v41  ;;  %v395_v1 = vld [vmem:[#allocation2 + $0x68] sm:$0xff] }
  0x8c   :  { %316 = vperm.xlu1 %579, %v294_v38   ;;  %369 = vperm.xlu0 %583, %v694_v31  }
  0x8d   :  { %509 = vmatpush3.msra.mxu0 %v395_v1 }
  0x8e   :  { %510 = vmatprep.subr.mxu0 %v641_v0 }
  0x8f   :  { %511 = vmatpush3.msra.mxu0 %v394_v44 }
  0x90   :  { %580 = vset.pattern.permute.xlu1 %v637_v39  ;;  %585 = vset.pattern.permute.xlu0 %v640_v2  ;;  %v485_v39 = vld [vmem:[%s757_s1 + $0x3] ss:$0 sm:$0xff] }
  0x91   :  { %332 = vperm.xlu1 %580, %v294_v38   ;;  %512 = vmatprep.subr.mxu0 %v641_v0 }
  0x92   :  { %513 = vmatpush3.msra.mxu0 %v393_v45 }
  0x93   :  { %514 = vmatprep.subr.mxu0 %v641_v0 }
  0x94   :  { %515 = vmatpush3.msra.mxu0 %v392_v46 }
  0x95   :  { %582 = vset.pattern.permute.xlu1 %v639_v41  ;;  %516 = vmatprep.subr.mxu0 %v641_v0 }
  0x96   :  { %364 = vperm.xlu1 %582, %v294_v38   ;;  %517 = vmatpush3.msra.mxu0 %v391_v47 }
  0x97   :  { %518 = vmatprep.subr.mxu0 %v641_v0 }
  0x98   :  { %519 = vmatpush3.msra.mxu0 %v390_v48 }
  0x99   :  { %520 = vmatprep.subr.mxu0 %v641_v0 }
  0x9a   :  { %584 = vset.pattern.permute.xlu1 %v640_v2  ;;  %521 = vmatpush3.msra.mxu0 %v389_v49 }
  0x9b   :  { %522 = vmatprep.subr.mxu0 %v641_v0 }
  0x9c   :  { %523 = vmatpush3.msra.mxu0 %v388_v50 }
  0x9d   :  { %524 = vmatprep.subr.mxu0 %v641_v0 }
  0x9e   :  { %525 = vmatpush3.msra.mxu0 %v387_v51 }
  0x9f   :  { %526 = vmatprep.subr.mxu0 %v641_v0 }
  0xa0   :  { %527 = vmatpush3.msra.mxu0 %v386_v52 }
  0xa1   :  { %528 = vmatprep.subr.mxu0 %v641_v0 }
  0xa2   :  { %529 = vmatpush3.msra.mxu0 %v385_v53 }
  0xa3   :  { %530 = vmatprep.subr.mxu0 %v641_v0 }
  0xa4   :  { %531 = vmatpush3.msra.mxu0 %v384_v21 }
  0xa5   :  { %532 = vmatprep.subr.mxu0 %v641_v0 }
  0xa6   :  { %533 = vmatpush3.msra.mxu0 %v383_v23 }
  0xa7   :  { %534 = vmatprep.subr.mxu0 %v641_v0 }
  0xa8   :  { %535 = vmatpush3.msra.mxu0 %v382_v24 }
  0xd3   :  { %v238_v54 = vpop.permute.xlu0 %237  ;;  %v246_v55 = vpop.permute.xlu1 %245 }
  0xd4   :  { %v240_v56 = vmul.f32 %v238_v54, %v694_v31 }
  0xd7   :  { %v242_v57 = vpop.permute.xlu0 %241  ;;  %v250_v58 = vpop.permute.xlu1 %249 }
  0xd8   :  { %v244_v59 = vmul.f32 %v242_v57, %v240_v56 }
  0xda   :  { %v248_v60 = vmul.f32 %v246_v55, %v244_v59 }
  0xdb   :  { %v254_v61 = vpop.permute.xlu0 %253  ;;  %v258_v62 = vpop.permute.xlu1 %257 }
  0xdc   :  { %v252_v63 = vmul.f32 %v250_v58, %v248_v60 }
  0xde   :  { %v256_v3 = vmul.f32 %v254_v61, %v252_v63 }
  0xdf   :  { %v262_v4 = vpop.permute.xlu0 %261  ;;  %v266_v6 = vpop.permute.xlu1 %265 }
  0xe0   :  { %v260_v7 = vmul.f32 %v258_v62, %v256_v3 }
  0xe2   :  { %v264_v8 = vmul.f32 %v262_v4, %v260_v7 }
  0xe3   :  { %v270_v9 = vpop.permute.xlu0 %269  ;;  %v274_v10 = vpop.permute.xlu1 %273 }
  0xe4   :  { %v268_v11 = vmul.f32 %v266_v6, %v264_v8 }
  0xe6   :  { %v272_v12 = vmul.f32 %v270_v9, %v268_v11 }
  0xe7   :  { %v278_v13 = vpop.permute.xlu0 %277  ;;  %v282_v14 = vpop.permute.xlu1 %281 }
  0xe8   :  { %v276_v15 = vmul.f32 %v274_v10, %v272_v12 }
  0xea   :  { %v280_v16 = vmul.f32 %v278_v13, %v276_v15 }
  0xeb   :  { %v286_v17 = vpop.permute.xlu0 %285  ;;  %v290_v19 = vpop.permute.xlu1 %289 }
  0xec   :  { %v284_v18 = vmul.f32 %v282_v14, %v280_v16 }
  0xee   :  { %v288_v20 = vmul.f32 %v286_v17, %v284_v18 }
  0xf0   :  { %v292_v22 = vmul.f32 %v290_v19, %v288_v20 }
  0xf2   :  { %376 = vperm.xlu1 %584, %v292_v22  }
  0xf8   :  { %v307_v25 = vpop.permute.xlu1 %306  ;;  %v322_v28 = vpop.permute.xlu0 %321 }
  0xfd   :  { %v338_v26 = vpop.permute.xlu1 %337  ;;  %v302_v31 = vpop.permute.xlu0 %301 }
  0xfe   :  { %v304_v33 = vmul.f32 %v482_v30, %v302_v31 }
 0x100   :  { %v309_v37 = vadd.f32 %v307_v25, %v304_v33 }
 0x102   :  { %v354_v27 = vpop.permute.xlu1 %353  ;;  %v349_v40 = vpop.permute.xlu0 %348 }
 0x103   :  { %v351_v0 = vmul.f32 %v485_v39, %v349_v40 }
 0x105   :  { %v356_v44 = vadd.f32 %v354_v27, %v351_v0 }
 0x107   :  { %v317_v5 = vpop.permute.xlu1 %316  ;;  %v370_v46 = vpop.permute.xlu0 %369 }
 0x108   :  { %v319_v32 = vmul.f32 %v483_v29, %v317_v5 }
 0x10a   :  { %v324_v36 = vadd.f32 %v322_v28, %v319_v32 }
 0x10c   :  { %v333_v35 = vpop.permute.xlu1 %332  ;;  %v325_v41 = vmul.f32 %v324_v36, %v309_v37 }
 0x10d   :  { %v335_v38 = vmul.f32 %v484_v34, %v333_v35 }
 0x10f   :  { %v340_v2 = vadd.f32 %v338_v26, %v335_v38 }
 0x111   :  { %v365_v43 = vpop.permute.xlu1 %364  ;;  %v341_v1 = vmul.f32 %v340_v2, %v325_v41 }
 0x112   :  { %v367_v45 = vmul.f32 %v486_v42, %v365_v43 }
 0x113   :  { %v357_v48 = vmul.f32 %v356_v44, %v341_v1 }
 0x114   :  { %v372_v47 = vadd.f32 %v370_v46, %v367_v45 }
 0x116   :  { %v373_v49 = vmul.f32 %v372_v47, %v357_v48 }
 0x16d   :  { %v377_v50 = vpop.permute.xlu1 %376 }
 0x16e   :  { %v379_v51 = vmul.f32 %v377_v50, %v373_v49 }
 0x170   :  { %v380_v52 = vmul.f32 %v379_v51, %v379_v51 }
 0x172   :  { %v381_v53 = vmul.f32 %v380_v52, %v380_v52 }
 0x174   :  { %537 = vmatmul.mubr.f32.vlgmr.msra.gmra.mxu0 %v381_v53 }
 0x234   :  { %v464_v54 = vpop.f32.mrf.mxu0 }
 0x235   :  { %468 = vst [vmem:[%s759_s3] sm:$0xff] %v464_v54 }
 0x236   :  { %v538_v55 = vpop.f32.mrf.mxu0 }
 0x237   :  { %473 = vsyncpa [#allocation3], 1 }

</bundles_post_ra>
